<compile_context>
chip_gen: v5e
topology: v5e:2x2
jax: 0.10.0
libtpu: 0.0.40
codegen_flags: <defaults>
</compile_context>

<pallas_src>
import functools

import jax
import jax.numpy as jnp
from jax.experimental import pallas as pl
from jax.experimental.pallas import tpu as pltpu


def _round_up(x: int, m: int) -> int:
    return ((x + m - 1) // m) * m


def _vmem_budget_bytes() -> int:
    """Generation-aware VMEM budget (~70% of physical per-core capacity)."""
    try:
        cap = int(pltpu.get_tpu_info().vmem_capacity_bytes)
    except Exception:
        cap = 64 << 20          # conservative fallback (v7x per-core capacity)
    return max(16 << 20, int(cap * 0.70))


def _choose_batch_tile(B, T_pad, D_pad, H_pad, in_itemsize, w_itemsize,
                       vmem_budget) -> int:
    """Largest 8-aligned batch tile fitting the VMEM budget, keeping the grid
    >= ~4 steps (>= 2 for small batches) for pipelining / megacore sharding."""
    B8 = _round_up(B, 8)
    # Per batch row, per grid step (bytes):
    per_row = (2 * T_pad * D_pad * in_itemsize    # frames tile, double-buffered
               + 2 * T_pad * H_pad * 4            # Ws + tanh(...) f32 intermediates
               + T_pad * D_pad * 4                # p * frames f32 product
               + 4 * D_pad * 4)                   # text + output tiles (db'ed)
    # Fixed: resident Wa/Ua (double-buffered) + Va/ba + slack.
    fixed = 2 * 2 * D_pad * H_pad * w_itemsize + 4 * H_pad * 4 + (1 << 20)
    tb_vmem = max(8, ((vmem_budget - fixed) // per_row // 8) * 8)
    if B8 >= 32:
        desired_steps = 4
    elif B8 >= 16:
        desired_steps = 2
    else:
        desired_steps = 1
    tb_steps = _round_up(pl.cdiv(B8, desired_steps), 8)
    return max(8, min(tb_vmem, tb_steps, B8))


def _temporal_attention_kernel(hf_ref, ht_ref, wa_ref, ua_ref, va_ref, ba_ref,
                               out_ref, *, t_valid: int, inv_attention: bool):
    # hf_ref : (TB, T_pad, D_pad)  frames for this batch tile (native dtype)
    # ht_ref : (TB, D_pad)         text features for this batch tile
    # wa_ref : (D_pad, H_pad), ua_ref : (D_pad, H_pad)   (native weight dtype)
    # va_ref : (1, H_pad) f32,  ba_ref : (1, H_pad) f32
    # out_ref: (TB, D_pad)
    tb, t_pad, d_pad = hf_ref.shape
    h_pad = wa_ref.shape[1]

    hf = hf_ref[...]                                       # (TB, T_pad, D_pad)
    ht = ht_ref[...]                                       # (TB, D_pad)

    # --- projections: big lane-dense MXU matmuls, f32 accumulation ---
    hf2 = hf.reshape(tb * t_pad, d_pad)                    # merge leading dims
    ws = jnp.dot(hf2, wa_ref[...],
                 preferred_element_type=jnp.float32)       # (TB*T_pad, H_pad)
    ws = ws.reshape(tb, t_pad, h_pad)
    uh = jnp.dot(ht, ua_ref[...],
                 preferred_element_type=jnp.float32)       # (TB, H_pad)
    uh_b = uh + ba_ref[...]                                 # fold bias into small tensor

    z = jnp.tanh(ws + uh_b[:, None, :])                    # (TB, T_pad, H_pad) f32

    # attention logits: contract H against Va (padded Va columns are zero).
    att = jnp.sum(z * va_ref[...], axis=-1)                # (TB, T_pad) f32

    if inv_attention:
        att = -att

    # mask padded time positions so softmax ignores them
    if t_pad != t_valid:
        t_idx = jax.lax.broadcasted_iota(jnp.int32, (tb, t_pad), 1)
        att = jnp.where(t_idx < t_valid, att, jnp.float32(-1e30))

    # softmax over time, numerically stable; denominator on the EUP approx path
    m = jnp.max(att, axis=-1, keepdims=True)
    e = jnp.exp(att - m)
    p = e * pl.reciprocal(jnp.sum(e, axis=-1, keepdims=True), approx=True)

    # weighted sum over time: VPU multiply + sublane-axis reduce (keeps MXU free)
    w = p[:, :, None] * hf                                  # (TB, T_pad, D_pad) f32
    out_ref[...] = jnp.sum(w, axis=1).astype(out_ref.dtype)


def temporal_attention(hidden_frames, hidden_text, Wa, Ua, Va, ba,
                       inv_attention: bool = False, batch_tile=None):
    """JAX wrapper reproducing TemporalAttentionModule.forward."""
    B, T, D = hidden_frames.shape
    H = Wa.shape[1]
    assert hidden_text.shape == (B, D)
    assert Ua.shape == (D, H) and Va.shape == (H,) and ba.shape == (1, 1, H)

    in_dtype = hidden_frames.dtype
    in_itemsize = jnp.dtype(in_dtype).itemsize
    w_itemsize = jnp.dtype(Wa.dtype).itemsize

    # lane/sublane-dense padding
    # (note: for D/H in (256, 384] on v6e/v7x a 256-aligned pad would fill the
    #  2x256x256 MXU better; kept 128-aligned here to minimize DMA waste.)
    D_pad = _round_up(D, 128)
    H_pad = _round_up(H, 128)
    T_pad = _round_up(T, 8)

    vmem_budget = _vmem_budget_bytes()

    if batch_tile is None:
        tb = _choose_batch_tile(B, T_pad, D_pad, H_pad,
                                in_itemsize, w_itemsize, vmem_budget)
    else:
        tb = max(8, (int(batch_tile) // 8) * 8)
    B_pad = _round_up(max(B, 8), tb)   # multiple of tb; sublane-dense stores

    # zero-pad inputs / weights (zeros are semantically inert for D/H padding;
    # padded T rows are masked in-kernel, padded batch rows are sliced off)
    hf = jnp.pad(hidden_frames, ((0, B_pad - B), (0, T_pad - T), (0, D_pad - D)))
    ht = jnp.pad(hidden_text, ((0, B_pad - B), (0, D_pad - D)))
    wa = jnp.pad(Wa, ((0, D_pad - D), (0, H_pad - H)))            # native dtype
    ua = jnp.pad(Ua, ((0, D_pad - D), (0, H_pad - H)))            # native dtype
    va = jnp.pad(Va.astype(jnp.float32).reshape(1, H), ((0, 0), (0, H_pad - H)))
    bb = jnp.pad(ba.astype(jnp.float32).reshape(1, H), ((0, 0), (0, H_pad - H)))

    kernel = functools.partial(_temporal_attention_kernel,
                               t_valid=T, inv_attention=inv_attention)

    out = pl.pallas_call(
        kernel,
        out_shape=jax.ShapeDtypeStruct((B_pad, D_pad), in_dtype),
        grid_spec=pltpu.PrefetchScalarGridSpec(
            num_scalar_prefetch=0,
            grid=(B_pad // tb,),
            in_specs=[
                pl.BlockSpec((tb, T_pad, D_pad), lambda i: (i, 0, 0)),  # frames
                pl.BlockSpec((tb, D_pad),        lambda i: (i, 0)),     # text
                pl.BlockSpec((D_pad, H_pad),     lambda i: (0, 0)),     # Wa
                pl.BlockSpec((D_pad, H_pad),     lambda i: (0, 0)),     # Ua
                pl.BlockSpec((1, H_pad),         lambda i: (0, 0)),     # Va
                pl.BlockSpec((1, H_pad),         lambda i: (0, 0)),     # ba
            ],
            out_specs=pl.BlockSpec((tb, D_pad), lambda i: (i, 0)),
        ),
        compiler_params=pltpu.CompilerParams(
            dimension_semantics=("parallel",),
            vmem_limit_bytes=int(vmem_budget)),
    )(hf, ht, wa, ua, va, bb)

    return out[:B, :D]


def reference_forward(hidden_frames, hidden_text, Wa, Ua, Va, ba,
                      inv_attention=False):
    """Pure-JAX reference matching the PyTorch module exactly."""
    Uh = hidden_text @ Ua
    Uh = Uh[:, None, :]
    Ws = hidden_frames @ Wa
    att = jnp.tanh(Ws + Uh + ba) @ Va
    if inv_attention:
        att = -att
    att = jax.nn.softmax(att, axis=1)
    ht_weighted = att[:, :, None] * hidden_frames
    return jnp.sum(ht_weighted, axis=1)


if __name__ == "__main__":
    key = jax.random.PRNGKey(0)

    # One "clean" config (T already 8-aligned, zero bias) and one exercising
    # T/D/H padding, the -inf time mask, nonzero bias, and inv_attention.
    configs = [
        dict(B=2, T=8, D=16, H=32, inv=False, bias_zero=True),
        dict(B=3, T=6, D=20, H=48, inv=True, bias_zero=False),
    ]

    for cfg in configs:
        B, T, D, H = cfg["B"], cfg["T"], cfg["D"], cfg["H"]
        key, k_hf, k_ht, k_wa, k_ua, k_va, k_ba = jax.random.split(key, 7)

        hidden_frames = jax.random.normal(k_hf, (B, T, D), dtype=jnp.float32)
        hidden_text = jax.random.normal(k_ht, (B, D), dtype=jnp.float32)

        # Parameter init mirroring init_weights(): N(0, 0.01); ba zero or random.
        Wa = 0.01 * jax.random.normal(k_wa, (D, H), dtype=jnp.float32)
        Ua = 0.01 * jax.random.normal(k_ua, (D, H), dtype=jnp.float32)
        Va = 0.01 * jax.random.normal(k_va, (H,), dtype=jnp.float32)
        if cfg["bias_zero"]:
            ba = jnp.zeros((1, 1, H), dtype=jnp.float32)
        else:
            ba = 0.01 * jax.random.normal(k_ba, (1, 1, H), dtype=jnp.float32)

        out = temporal_attention(hidden_frames, hidden_text, Wa, Ua, Va, ba,
                                 inv_attention=cfg["inv"])
        out = jax.block_until_ready(out)

        ref = reference_forward(hidden_frames, hidden_text, Wa, Ua, Va, ba,
                                inv_attention=cfg["inv"])
        assert out.shape == (B, D)
        err = jnp.max(jnp.abs(out - ref))
        # Tolerance relaxed slightly vs. exact f32: the softmax denominator uses
        # the EUP approximate reciprocal (pl.reciprocal(..., approx=True)).
        assert jnp.allclose(out, ref, atol=5e-3, rtol=5e-3), (
            f"mismatch (cfg={cfg}): max abs err {err}")

    print("KERNEL_OK")
</pallas_src>

<mosaic_0001>
module attributes {stable_mosaic.version = 11 : i64} {
  func.func @_temporal_attention_kernel(%arg0: i32, %arg1: memref<8x8x128xf32, #tpu.memory_space<vmem>>, %arg2: memref<8x128xf32, #tpu.memory_space<vmem>>, %arg3: memref<128x128xf32, #tpu.memory_space<vmem>>, %arg4: memref<128x128xf32, #tpu.memory_space<vmem>>, %arg5: memref<1x128xf32, #tpu.memory_space<vmem>>, %arg6: memref<1x128xf32, #tpu.memory_space<vmem>>, %arg7: memref<8x128xf32, #tpu.memory_space<vmem>>) attributes {dimension_semantics = [#tpu.dimension_semantics<parallel>], iteration_bounds = array<i64: 1>, scalar_prefetch = 0 : i64, scratch_operands = 0 : i64, tpu.core_type = #tpu.core_type<tc>, window_params = [{transform_indices = @transform_0, window_bounds = array<i64: 8, 8, 128>}, {transform_indices = @transform_1, window_bounds = array<i64: 8, 128>}, {pipeline_mode = #tpu.pipeline_mode<synchronous>, transform_indices = @transform_2, window_bounds = array<i64: 128, 128>}, {pipeline_mode = #tpu.pipeline_mode<synchronous>, transform_indices = @transform_3, window_bounds = array<i64: 128, 128>}, {pipeline_mode = #tpu.pipeline_mode<synchronous>, transform_indices = @transform_4, window_bounds = array<i64: 1, 128>}, {pipeline_mode = #tpu.pipeline_mode<synchronous>, transform_indices = @transform_5, window_bounds = array<i64: 1, 128>}, {transform_indices = @transform_6, window_bounds = array<i64: 8, 128>}]} {
    %c0 = arith.constant 0 : index
    %c0_0 = arith.constant 0 : index
    %c0_1 = arith.constant 0 : index
    %0 = vector.load %arg1[%c0, %c0_0, %c0_1] : memref<8x8x128xf32, #tpu.memory_space<vmem>>, vector<8x8x128xf32>
    %c0_2 = arith.constant 0 : index
    %c0_3 = arith.constant 0 : index
    %1 = vector.load %arg2[%c0_2, %c0_3] : memref<8x128xf32, #tpu.memory_space<vmem>>, vector<8x128xf32>
    %2 = vector.shape_cast %0 : vector<8x8x128xf32> to vector<64x128xf32>
    %c0_4 = arith.constant 0 : index
    %c0_5 = arith.constant 0 : index
    %3 = vector.load %arg3[%c0_4, %c0_5] : memref<128x128xf32, #tpu.memory_space<vmem>>, vector<128x128xf32>
    %cst = arith.constant dense<0.000000e+00> : vector<64x128xf32>
    %4 = tpu.matmul %2, %3, %cst {dimension_numbers = #tpu.dot_dimension_numbers<[1], [0], [0], [1], [0, 0, 1, 1], [], []>} : vector<64x128xf32>, vector<128x128xf32>, vector<64x128xf32> -> vector<64x128xf32>
    %5 = vector.shape_cast %4 : vector<64x128xf32> to vector<8x8x128xf32>
    %c0_6 = arith.constant 0 : index
    %c0_7 = arith.constant 0 : index
    %6 = vector.load %arg4[%c0_6, %c0_7] : memref<128x128xf32, #tpu.memory_space<vmem>>, vector<128x128xf32>
    %cst_8 = arith.constant dense<0.000000e+00> : vector<8x128xf32>
    %7 = tpu.matmul %1, %6, %cst_8 {dimension_numbers = #tpu.dot_dimension_numbers<[1], [0], [0], [1], [0, 0, 1, 1], [], []>} : vector<8x128xf32>, vector<128x128xf32>, vector<8x128xf32> -> vector<8x128xf32>
    %c0_9 = arith.constant 0 : index
    %c0_10 = arith.constant 0 : index
    %8 = vector.load %arg6[%c0_9, %c0_10] : memref<1x128xf32, #tpu.memory_space<vmem>>, vector<1x128xf32>
    %9 = vector.broadcast %8 : vector<1x128xf32> to vector<8x128xf32>
    %10 = arith.addf %7, %9 : vector<8x128xf32>
    %11 = vector.shape_cast %10 : vector<8x128xf32> to vector<8x1x128xf32>
    %12 = vector.broadcast %11 : vector<8x1x128xf32> to vector<8x8x128xf32>
    %13 = arith.addf %5, %12 : vector<8x8x128xf32>
    %14 = math.tanh %13 : vector<8x8x128xf32>
    %c0_11 = arith.constant 0 : index
    %c0_12 = arith.constant 0 : index
    %15 = vector.load %arg5[%c0_11, %c0_12] : memref<1x128xf32, #tpu.memory_space<vmem>>, vector<1x128xf32>
    %16 = vector.shape_cast %15 : vector<1x128xf32> to vector<1x1x128xf32>
    %17 = vector.broadcast %16 : vector<1x1x128xf32> to vector<8x8x128xf32>
    %18 = arith.mulf %14, %17 : vector<8x8x128xf32>
    %cst_13 = arith.constant dense<0.000000e+00> : vector<8x8xf32>
    %19 = vector.multi_reduction <add>, %18, %cst_13 [2] : vector<8x8x128xf32> to vector<8x8xf32>
    %cst_14 = arith.constant dense<0xFF800000> : vector<8xf32>
    %20 = vector.multi_reduction <maximumf>, %19, %cst_14 [1] : vector<8x8xf32> to vector<8xf32>
    %21 = vector.shape_cast %20 : vector<8xf32> to vector<8x1xf32>
    %22 = vector.broadcast %21 : vector<8x1xf32> to vector<8x8xf32>
    %23 = arith.subf %19, %22 : vector<8x8xf32>
    %24 = math.exp %23 : vector<8x8xf32>
    %cst_15 = arith.constant dense<0.000000e+00> : vector<8xf32>
    %25 = vector.multi_reduction <add>, %24, %cst_15 [1] : vector<8x8xf32> to vector<8xf32>
    %26 = vector.shape_cast %25 : vector<8xf32> to vector<8x1xf32>
    %27 = tpu.reciprocal %26 {approx = true} : vector<8x1xf32> -> vector<8x1xf32>
    %28 = vector.broadcast %27 : vector<8x1xf32> to vector<8x8xf32>
    %29 = arith.mulf %24, %28 : vector<8x8xf32>
    %30 = vector.shape_cast %29 : vector<8x8xf32> to vector<8x8x1xf32>
    %31 = vector.broadcast %30 : vector<8x8x1xf32> to vector<8x8x128xf32>
    %32 = arith.mulf %31, %0 : vector<8x8x128xf32>
    %cst_16 = arith.constant dense<0.000000e+00> : vector<8x128xf32>
    %33 = vector.multi_reduction <add>, %32, %cst_16 [1] : vector<8x8x128xf32> to vector<8x128xf32>
    %c0_17 = arith.constant 0 : index
    %c0_18 = arith.constant 0 : index
    %34 = vector.load %arg7[%c0_17, %c0_18] : memref<8x128xf32, #tpu.memory_space<vmem>>, vector<8x128xf32>
    tpu.vector_store %arg7[%c0_17, %c0_18], %33 {strides = array<i32>} : memref<8x128xf32, #tpu.memory_space<vmem>>, vector<8x128xf32>,
    return
  }
  func.func @transform_0(%arg0: i32) -> (i32, i32, i32) {
    %c0_i32 = arith.constant 0 : i32
    %c0_i32_0 = arith.constant 0 : i32
    %c0_i32_1 = arith.constant 0 : i32
    return %arg0, %c0_i32, %c0_i32_0 : i32, i32, i32
  }
  func.func @transform_1(%arg0: i32) -> (i32, i32) {
    %c0_i32 = arith.constant 0 : i32
    %c0_i32_0 = arith.constant 0 : i32
    return %arg0, %c0_i32 : i32, i32
  }
  func.func @transform_2(%arg0: i32) -> (i32, i32) {
    %c0_i32 = arith.constant 0 : i32
    %c0_i32_0 = arith.constant 0 : i32
    %c0_i32_1 = arith.constant 0 : i32
    return %c0_i32, %c0_i32_0 : i32, i32
  }
  func.func @transform_3(%arg0: i32) -> (i32, i32) {
    %c0_i32 = arith.constant 0 : i32
    %c0_i32_0 = arith.constant 0 : i32
    %c0_i32_1 = arith.constant 0 : i32
    return %c0_i32, %c0_i32_0 : i32, i32
  }
  func.func @transform_4(%arg0: i32) -> (i32, i32) {
    %c0_i32 = arith.constant 0 : i32
    %c0_i32_0 = arith.constant 0 : i32
    %c0_i32_1 = arith.constant 0 : i32
    return %c0_i32, %c0_i32_0 : i32, i32
  }
  func.func @transform_5(%arg0: i32) -> (i32, i32) {
    %c0_i32 = arith.constant 0 : i32
    %c0_i32_0 = arith.constant 0 : i32
    %c0_i32_1 = arith.constant 0 : i32
    return %c0_i32, %c0_i32_0 : i32, i32
  }
  func.func @transform_6(%arg0: i32) -> (i32, i32) {
    %c0_i32 = arith.constant 0 : i32
    %c0_i32_0 = arith.constant 0 : i32
    return %arg0, %c0_i32 : i32, i32
  }
}

</mosaic_0001>

<bundles_post_ra>
// kernel: tpu_custom_call.1
= control target key start
LH: loop header
LB: loop body
LE: loop exit
PB: predicated region body
PF: predicated region fallthrough
CT: control target
= control target key end

     0   :  { %11 = vsyncpa [#allocation3], 0  ;;  %s894_s0 = inlined_call_operand.hbm [shape: f32[8,8,128], index: 0, kind: input, shape index: {}]   ;;  %s895_s1 = inlined_call_operand.hbm [shape: f32[8,128], index: 1, kind: input, shape index: {}]   ;;  %s896_s2 = inlined_call_operand.hbm [shape: f32[128,128], index: 2, kind: input, shape index: {}]   ;;  %s897_s3 = inlined_call_operand.hbm [shape: f32[128,128], index: 3, kind: input, shape index: {}]   ;;  %s898_s4 = inlined_call_operand.vmem [shape: f32[1,128], index: 4, kind: input, shape index: {}]   ;;  %s899_s5 = inlined_call_operand.vmem [shape: f32[1,128], index: 5, kind: input, shape index: {}]   ;;  %s900_s6 = inlined_call_operand.hbm [shape: f32[8,128], index: 6, kind: output, shape index: {}]  }
   0x1   :  { %12 = vsyncpa [#allocation6], 0 }
   0x2   :  { %13 = vsyncpa [#allocation9], 0  ;;  %s33_s23 = sshll.u32 %s895_s1, 4  ;;  %s34_s23 = int_to_ptr.hbm [resolvable:$true] %s33_s23 }
   0x3   :  { %14 = vsyncpa [#allocation4], 0  ;;  %s753_s24 = smov [#allocation5]   ;;  %s19_s28 = sshll.u32 %s894_s0, 4  ;;  %s20_s28 = int_to_ptr.hbm [resolvable:$true] %s19_s28 }
   0x4   :  { %s35_s25 = sshll.u32 %s753_s24, 4  ;;  %s754_s29 = smov [#allocation2]   ;;  %s36_s25 = int_to_ptr.vmem [resolvable:$true] %s35_s25 }
   0x5   :  { %38 = dma.hbm_to_vmem [thread:$0]  %s34_s23, 128, %s36_s25, [#allocation6]  }
   0x6   :  { %s21_s30 = sshll.u32 %s754_s29, 4  ;;  %s755_s7 = smov 128   ;;  %s22_s30 = int_to_ptr.vmem [resolvable:$true] %s21_s30 }
   0x7   :  { %s756_s8 = smov 8   ;;  %s43_s1 = sshll.u32 %s896_s2, 4  ;;  %s44_s1 = int_to_ptr.hbm [resolvable:$true] %s43_s1 }
   0x8   :  { %27 = dma.hbm_to_vmem [thread:$0]  %s20_s28, 1024, %s22_s30, [#allocation3], %s755_s7, %s755_s7, %s756_s8  }
   0x9   :  { %s757_s11 = smov [#allocation7]   ;;  %s56_s0 = sshll.u32 %s897_s3, 4  ;;  %s57_s0 = int_to_ptr.hbm [resolvable:$true] %s56_s0 }
   0xa   :  { %s45_s12 = sshll.u32 %s757_s11, 4  ;;  %s758_s15 = smov [#allocation8]   ;;  %s46_s12 = int_to_ptr.vmem [resolvable:$true] %s45_s12 }
   0xb   :  { %51 = dma.hbm_to_vmem [thread:$0]  %s44_s1, 2048, %s46_s12, [#allocation6], %s755_s7, %s755_s7, %s756_s8  }
   0xc   :  { %s58_s16 = sshll.u32 %s758_s15, 4  ;;  %s59_s16 = int_to_ptr.vmem [resolvable:$true] %s58_s16 }
   0xd   :  { %64 = dma.hbm_to_vmem [thread:$0]  %s57_s0, 2048, %s59_s16, [#allocation9], %s755_s7, %s755_s7, %s756_s8  }
   0xe   :  { %745 = dma.done.wait [#allocation3], 1024  }
   0xf   :  { %746 = vsyncadd [#allocation3], 4294966272 }
  0x10   :  { %747 = dma.done.wait [#allocation6], 2176  }
  0x11   :  { %748 = vsyncadd [#allocation6], 4294965120 }
  0x12   :  { %749 = dma.done.wait [#allocation9], 2048  }
  0x13   :  { %750 = vsyncadd [#allocation9], 4294965248  ;;  %v109_v0 = vld [vmem:[#allocation7 + $0x78] sm:$0xff]  ;;  %v108_v2 = vld [vmem:[#allocation7 + $0x70] sm:$0xff]  ;;  %vm277_vm0 = vcmask 1041409   ;;  %vm279_vm1 = vcmask 1042434  }
  0x14   :  { %v166_v1 = vld [vmem:[#allocation8 + $0x78] sm:$0xff]  ;;  %546 = vmatpush.msra.mxu2 %v109_v0  ;;  %547 = vmatpush.msra.mxu3 %v109_v0  ;;  %v165_v3 = vld [vmem:[#allocation8 + $0x70] sm:$0xff]  ;;  %v107_v4 = vld [vmem:[#allocation7 + $0x68] sm:$0xff]  ;;  %vm281_vm2 = vcmask 1043459   ;;  %vm283_vm3 = vcmask 1044484   ;;  %vm285_vm4 = vcmask 1045509  }
  0x15   :  { %171 = vmatpush.msra.mxu1 %v166_v1  ;;  %110 = vmatpush.msra.mxu0 %v109_v0  ;;  %v164_v5 = vld [vmem:[#allocation8 + $0x68] sm:$0xff]  ;;  %v106_v6 = vld [vmem:[#allocation7 + $0x60] sm:$0xff]  ;;  %v105_v8 = vld [vmem:[#allocation7 + $0x58] sm:$0xff]  ;;  %vm287_vm5 = vcmask 1046534   ;;  %vm289_vm6 = vcmask 1047559   ;;  %vm292_vm7 = vcmask 64512  }
  0x16   :  { %548 = vmatpush.msra.mxu2 %v108_v2  ;;  %549 = vmatpush.msra.mxu3 %v108_v2  ;;  %v163_v7 = vld [vmem:[#allocation8 + $0x60] sm:$0xff]  ;;  %v162_v9 = vld [vmem:[#allocation8 + $0x58] sm:$0xff]  ;;  %v104_v10 = vld [vmem:[#allocation7 + $0x50] sm:$0xff]  ;;  %s534_s21 = sshll.u32 %s900_s6, 4  ;;  %s535_s21 = int_to_ptr.hbm [resolvable:$true] %s534_s21 }
  0x17   :  { %172 = vmatpush.msra.mxu1 %v165_v3  ;;  %111 = vmatpush.msra.mxu0 %v108_v2  ;;  %v161_v11 = vld [vmem:[#allocation8 + $0x50] sm:$0xff]  ;;  %v103_v12 = vld [vmem:[#allocation7 + $0x48] sm:$0xff]  ;;  %v102_v14 = vld [vmem:[#allocation7 + $0x40] sm:$0xff] }
  0x18   :  { %550 = vmatpush.msra.mxu2 %v107_v4  ;;  %551 = vmatpush.msra.mxu3 %v107_v4  ;;  %v160_v13 = vld [vmem:[#allocation8 + $0x48] sm:$0xff]  ;;  %v159_v15 = vld [vmem:[#allocation8 + $0x40] sm:$0xff]  ;;  %v101_v16 = vld [vmem:[#allocation7 + $0x38] sm:$0xff] }
  0x19   :  { %173 = vmatpush.msra.mxu1 %v164_v5  ;;  %112 = vmatpush.msra.mxu0 %v107_v4  ;;  %v158_v17 = vld [vmem:[#allocation8 + $0x38] sm:$0xff]  ;;  %v100_v18 = vld [vmem:[#allocation7 + $0x30] sm:$0xff]  ;;  %v99_v20 = vld [vmem:[#allocation7 + $0x28] sm:$0xff] }
  0x1a   :  { %552 = vmatpush.msra.mxu2 %v106_v6  ;;  %553 = vmatpush.msra.mxu3 %v106_v6  ;;  %v157_v19 = vld [vmem:[#allocation8 + $0x30] sm:$0xff]  ;;  %v156_v21 = vld [vmem:[#allocation8 + $0x28] sm:$0xff]  ;;  %v98_v22 = vld [vmem:[#allocation7 + $0x20] sm:$0xff] }
  0x1b   :  { %174 = vmatpush.msra.mxu1 %v163_v7  ;;  %113 = vmatpush.msra.mxu0 %v106_v6  ;;  %v155_v23 = vld [vmem:[#allocation8 + $0x20] sm:$0xff]  ;;  %v97_v24 = vld [vmem:[#allocation7 + $0x18] sm:$0xff]  ;;  %v96_v26 = vld [vmem:[#allocation7 + $0x10] sm:$0xff] }
  0x1c   :  { %554 = vmatpush.msra.mxu2 %v105_v8  ;;  %555 = vmatpush.msra.mxu3 %v105_v8  ;;  %v154_v25 = vld [vmem:[#allocation8 + $0x18] sm:$0xff]  ;;  %v153_v27 = vld [vmem:[#allocation8 + $0x10] sm:$0xff]  ;;  %v95_v28 = vld [vmem:[#allocation7 + $0x8] sm:$0xff] }
  0x1d   :  { %175 = vmatpush.msra.mxu1 %v162_v9  ;;  %114 = vmatpush.msra.mxu0 %v105_v8  ;;  %v152_v29 = vld [vmem:[#allocation8 + $0x8] sm:$0xff]  ;;  %v94_v30 = vld [vmem:[#allocation7] sm:$0xff]  ;;  %v93_v34 = vld [vmem:[#allocation5] sm:$0xff] }
  0x1e   :  { %556 = vmatpush.msra.mxu2 %v104_v10  ;;  %557 = vmatpush.msra.mxu3 %v104_v10  ;;  %v151_v31 = vld [vmem:[#allocation8] sm:$0xff]  ;;  %v808_v32 = vld [vmem:[#allocation2 + $0x10] sm:$0xff]  ;;  %v813_v35 = vld [vmem:[#allocation2] sm:$0xff] }
  0x1f   :  { %176 = vmatpush.msra.mxu1 %v161_v11  ;;  %115 = vmatpush.msra.mxu0 %v104_v10  ;;  %v810_v33 = vld [vmem:[#allocation2 + $0x28] sm:$0xff]  ;;  %v817_v36 = vld [vmem:[#allocation2 + $0x18] sm:$0xff]  ;;  %v819_v37 = vld [vmem:[#allocation2 + $0x30] sm:$0xff] }
  0x20   :  { %558 = vmatpush.msra.mxu2 %v103_v12  ;;  %559 = vmatpush.msra.mxu3 %v103_v12  ;;  %v822_v38 = vld [vmem:[#allocation2 + $0x8] sm:$0xff]  ;;  %v826_v39 = vld [vmem:[#allocation2 + $0x20] sm:$0xff]  ;;  %v828_v40 = vld [vmem:[#allocation2 + $0x38] sm:$0xff] }
  0x21   :  { %177 = vmatpush.msra.mxu1 %v160_v13  ;;  %116 = vmatpush.msra.mxu0 %v103_v12  ;;  %v589_v41 = vld [vmem:[%s899_s5] ss:$0 sm:$0xff] }
  0x22   :  { %560 = vmatpush.msra.mxu2 %v102_v14  ;;  %561 = vmatpush.msra.mxu3 %v102_v14  ;;  %v590_v58 = vld [vmem:[%s898_s4] ss:$0 sm:$0xff]  ;;  %s760_s4 = smov [#allocation10]  }
  0x23   :  { %178 = vmatpush.msra.mxu1 %v159_v15  ;;  %117 = vmatpush.msra.mxu0 %v102_v14  ;;  %s532_s18 = sshll.u32 %s760_s4, 4  ;;  %s533_s18 = int_to_ptr.vmem [resolvable:$true] %s532_s18 }
  0x24   :  { %562 = vmatpush.msra.mxu2 %v101_v16  ;;  %563 = vmatpush.msra.mxu3 %v101_v16 }
  0x25   :  { %179 = vmatpush.msra.mxu1 %v158_v17  ;;  %118 = vmatpush.msra.mxu0 %v101_v16 }
  0x26   :  { %564 = vmatpush.msra.mxu2 %v100_v18  ;;  %565 = vmatpush.msra.mxu3 %v100_v18 }
  0x27   :  { %180 = vmatpush.msra.mxu1 %v157_v19  ;;  %119 = vmatpush.msra.mxu0 %v100_v18 }
  0x28   :  { %566 = vmatpush.msra.mxu2 %v99_v20  ;;  %567 = vmatpush.msra.mxu3 %v99_v20 }
  0x29   :  { %181 = vmatpush.msra.mxu1 %v156_v21  ;;  %120 = vmatpush.msra.mxu0 %v99_v20 }
  0x2a   :  { %568 = vmatpush.msra.mxu2 %v98_v22  ;;  %569 = vmatpush.msra.mxu3 %v98_v22 }
  0x2b   :  { %182 = vmatpush.msra.mxu1 %v155_v23  ;;  %121 = vmatpush.msra.mxu0 %v98_v22 }
  0x2c   :  { %570 = vmatpush.msra.mxu2 %v97_v24  ;;  %571 = vmatpush.msra.mxu3 %v97_v24 }
  0x2d   :  { %183 = vmatpush.msra.mxu1 %v154_v25  ;;  %122 = vmatpush.msra.mxu0 %v97_v24 }
  0x2e   :  { %572 = vmatpush.msra.mxu2 %v96_v26  ;;  %573 = vmatpush.msra.mxu3 %v96_v26 }
  0x2f   :  { %184 = vmatpush.msra.mxu1 %v153_v27  ;;  %123 = vmatpush.msra.mxu0 %v96_v26 }
  0x30   :  { %574 = vmatpush.msra.mxu2 %v95_v28  ;;  %575 = vmatpush.msra.mxu3 %v95_v28 }
  0x31   :  { %185 = vmatpush.msra.mxu1 %v152_v29  ;;  %124 = vmatpush.msra.mxu0 %v95_v28 }
  0x32   :  { %576 = vmatpush.msra.mxu2 %v94_v30  ;;  %577 = vmatpush.msra.mxu3 %v94_v30 }
  0x33   :  { %186 = vmatpush.msra.mxu1 %v151_v31  ;;  %132 = vmatmul.f32.vlgmr.msra.gmra.mxu2 %v808_v32 }
  0x34   :  { %141 = vmatmul.f32.vlgmr.msra.gmra.mxu3 %v810_v33  ;;  %187 = vmatmul.f32.vlgmr.msra.gmra.mxu1 %v93_v34 }
  0x35   :  { %125 = vmatpush.msra.mxu0 %v94_v30  ;;  %v267_v30 = vlaneseq }
  0x36   :  { %126 = vmatmul.f32.vlgmr.msra.gmra.mxu0 %v813_v35 }
  0x37   :  { %v838_v34 = vand.u32 127, %v267_v30 }
  0x3b   :  { %135 = vmatmul.f32.gmra.mxu2 %v817_v36 }
  0x3c   :  { %144 = vmatmul.f32.gmra.mxu3 %v819_v37 }
  0x3e   :  { %129 = vmatmul.f32.gmra.mxu0 %v822_v38 }
  0x43   :  { %138 = vmatmul.f32.gmra.mxu2 %v826_v39 }
  0x44   :  { %147 = vmatmul.f32.gmra.mxu3 %v828_v40 }
  0xb1   :  { %v188_v42 = vpop.f32.mrf.mxu1 }
  0xb2   :  { %v189_v43 = vadd.f32 %v589_v41, %v188_v42 }
  0xb3   :  { %v127_v44 = vpop.f32.mrf.mxu0 }
  0xb4   :  { %v199_v45 = vperm.slane %v189_v43, 0  ;;  %v193_v46 = vrot.slane %v189_v43, 2  ;;  %v192_v47 = vrot.slane %v189_v43, 1  ;;  %v194_v52 = vrot.slane %v189_v43, 3 }
  0xb5   :  { %v197_v55 = vrot.slane %v189_v43, 6  ;;  %v195_v4 = vrot.slane %v189_v43, 4  ;;  %v198_v6 = vrot.slane %v189_v43, 7  ;;  %v196_v7 = vrot.slane %v189_v43, 5 }
  0xb6   :  { %v215_v48 = vadd.f32 %v199_v45, %v127_v44  ;;  %v133_v49 = vpop.f32.mrf.mxu2  ;;  %v201_v50 = vperm.slane %v193_v46, 0  ;;  %v200_v54 = vperm.slane %v192_v47, 0  ;;  %v202_v57 = vperm.slane %v194_v52, 0 }
  0xb7   :  { %v142_v51 = vpop.f32.mrf.mxu3  ;;  %v205_v62 = vperm.slane %v197_v55, 0  ;;  %v203_v9 = vperm.slane %v195_v4, 0  ;;  %v206_v12 = vperm.slane %v198_v6, 0  ;;  %v204_v14 = vperm.slane %v196_v7, 0 }
  0xb8   :  { %591 = vtanh.f32 %v215_v48  ;;  %v217_v53 = vadd.f32 %v201_v50, %v133_v49 }
  0xb9   :  { %v220_v19 = vadd.f32 %v204_v14, %v142_v51 }
  0xba   :  { %593 = vtanh.f32 %v217_v53 }
  0xbb   :  { %v130_v56 = vpop.f32.mrf.mxu0 }
  0xbc   :  { %v216_v59 = vadd.f32 %v200_v54, %v130_v56 }
  0xbe   :  { %v592_v60 = vpop.eup %591  ;;  %595 = vtanh.f32 %v216_v59  ;;  %v136_v61 = vpop.f32.mrf.mxu2 }
  0xbf   :  { %v218_v63 = vadd.f32 %v202_v57, %v136_v61  ;;  %v145_v0 = vpop.f32.mrf.mxu3  ;;  %v235_v1 = vmul.f32 %v592_v60, %v590_v58 }
  0xc0   :  { %v594_v2 = vpop.eup %593  ;;  %v221_v5 = vadd.f32 %v205_v62, %v145_v0  ;;  %v759_v62 = vmov 0  }
  0xc1   :  { %597 = vtanh.f32 %v218_v63  ;;  %243 = vadd.xlane.f32.xlu0 %v235_v1  ;;  %v237_v3 = vmul.f32 %v594_v2, %v590_v58  ;;  %588 = vset.pattern.permute.xlu2 %v759_v62 }
  0xc2   :  { %599 = vtanh.f32 %v221_v5  ;;  %587 = vset.pattern.permute.xlu1 %v759_v62  ;;  %586 = vset.pattern.permute.xlu0 %v759_v62 }
  0xc3   :  { %247 = vadd.xlane.f32.xlu1 %v237_v3 }
  0xc4   :  { %v596_v8 = vpop.eup %595 }
  0xc5   :  { %v236_v10 = vmul.f32 %v596_v8, %v590_v58 }
  0xc6   :  { %v139_v11 = vpop.f32.mrf.mxu2 }
  0xc7   :  { %v598_v13 = vpop.eup %597  ;;  %v219_v15 = vadd.f32 %v203_v9, %v139_v11  ;;  %v148_v16 = vpop.f32.mrf.mxu3 }
  0xc8   :  { %v222_v17 = vadd.f32 %v206_v12, %v148_v16  ;;  %v238_v18 = vmul.f32 %v598_v13, %v590_v58  ;;  %v600_v20 = vpop.eup %599 }
  0xc9   :  { %601 = vtanh.f32 %v219_v15  ;;  %245 = vadd.xlane.f32.xlu0 %v236_v10  ;;  %v241_v22 = vmul.f32 %v600_v20, %v590_v58 }
  0xca   :  { %603 = vtanh.f32 %v222_v17 }
  0xcb   :  { %249 = vadd.xlane.f32.xlu1 %v238_v18  ;;  %605 = vtanh.f32 %v220_v19 }
  0xcf   :  { %v602_v21 = vpop.eup %601 }
  0xd0   :  { %v604_v23 = vpop.eup %603  ;;  %v239_v24 = vmul.f32 %v602_v21, %v590_v58 }
  0xd1   :  { %255 = vadd.xlane.f32.xlu0 %v241_v22  ;;  %v242_v25 = vmul.f32 %v604_v23, %v590_v58  ;;  %v606_v26 = vpop.eup %605 }
  0xd2   :  { %251 = vadd.xlane.f32.xlu2 %v239_v24  ;;  %v240_v27 = vmul.f32 %v606_v26, %v590_v58 }
  0xd3   :  { %257 = vadd.xlane.f32.xlu1 %v242_v25 }
  0xda   :  { %253 = vadd.xlane.f32.xlu2 %v240_v27 }
 0x134   :  { %v244_v28 = vpop.xlane.xlu0 %243 }
 0x135   :  { %v269_v42 = vperm.slane %v244_v28, %v838_v34 }
 0x136   :  { %v248_v29 = vpop.xlane.xlu1 %247 }
 0x137   :  { %v271_v46 = vperm.slane %v248_v29, %v838_v34 }
 0x13c   :  { %v246_v31 = vpop.xlane.xlu0 %245 }
 0x13d   :  { %v270_v43 = vperm.slane %v246_v31, %v838_v34 }
 0x13e   :  { %v250_v41 = vpop.xlane.xlu1 %249 }
 0x13f   :  { %v278_v45 = vsel %vm277_vm0, %v270_v43, %v269_v42  ;;  %v272_v47 = vperm.slane %v250_v41, %v838_v34 }
 0x140   :  { %v280_v48 = vsel %vm279_vm1, %v271_v46, %v278_v45 }
 0x141   :  { %v282_v53 = vsel %vm281_vm2, %v272_v47, %v280_v48 }
 0x144   :  { %v256_v50 = vpop.xlane.xlu0 %255 }
 0x145   :  { %v252_v44 = vpop.xlane.xlu2 %251  ;;  %v275_v55 = vperm.slane %v256_v50, %v838_v34 }
 0x146   :  { %v273_v49 = vperm.slane %v252_v44, %v838_v34  ;;  %v258_v51 = vpop.xlane.xlu1 %257 }
 0x147   :  { %v276_v57 = vperm.slane %v258_v51, %v838_v34 }
 0x148   :  { %v284_v56 = vsel %vm283_vm3, %v273_v49, %v282_v53 }
 0x14d   :  { %v254_v52 = vpop.xlane.xlu2 %253 }
 0x14e   :  { %v274_v54 = vperm.slane %v254_v52, %v838_v34 }
 0x150   :  { %v286_v58 = vsel %vm285_vm4, %v274_v54, %v284_v56 }
 0x151   :  { %v288_v59 = vsel %vm287_vm5, %v275_v55, %v286_v58 }
 0x152   :  { %v290_v60 = vsel %vm289_vm6, %v276_v57, %v288_v59 }
 0x153   :  { %v293_v61 = vsel %vm292_vm7, %v290_v60, -inf }
 0x154   :  { %294 = vmax.xlane.f32.xlu2 %v293_v61 }
 0x1c7   :  { %v295_v63 = vpop.xlane.xlu2 %294 }
 0x1c8   :  { %v299_v0 = vperm.slane %v295_v63, 2  ;;  %v298_v1 = vperm.slane %v295_v63, 1  ;;  %v297_v2 = vperm.slane %v295_v63, 0  ;;  %v300_v6 = vperm.slane %v295_v63, 3 }
 0x1c9   :  { %v301_v7 = vperm.slane %v295_v63, 4  ;;  %v304_v8 = vperm.slane %v295_v63, 7  ;;  %v302_v16 = vperm.slane %v295_v63, 5  ;;  %v303_v18 = vperm.slane %v295_v63, 6 }
 0x1ca   :  { %v315_v3 = vsub.f32 %v248_v29, %v299_v0  ;;  %v314_v4 = vsub.f32 %v246_v31, %v298_v1  ;;  %v313_v5 = vsub.f32 %v244_v28, %v297_v2  ;;  %v316_v12 = vsub.f32 %v250_v41, %v300_v6 }
 0x1cb   :  { %v317_v13 = vsub.f32 %v252_v44, %v301_v7  ;;  %v320_v14 = vsub.f32 %v258_v51, %v304_v8  ;;  %v318_v23 = vsub.f32 %v254_v52, %v302_v16  ;;  %v319_v24 = vsub.f32 %v256_v50, %v303_v18 }
 0x1cc   :  { %v325_v9 = vmul.f32 1.442695, %v315_v3  ;;  %v323_v10 = vmul.f32 1.442695, %v314_v4  ;;  %v321_v11 = vmul.f32 1.442695, %v313_v5 }
 0x1cd   :  { %v327_v15 = vmul.f32 1.442695, %v316_v12  ;;  %v329_v17 = vmul.f32 1.442695, %v317_v13  ;;  %v335_v20 = vmul.f32 1.442695, %v320_v14 }
 0x1ce   :  { %607 = vpow2.f32 %v325_v9  ;;  %v331_v25 = vmul.f32 1.442695, %v318_v23  ;;  %v333_v26 = vmul.f32 1.442695, %v319_v24 }
 0x1cf   :  { %609 = vpow2.f32 %v323_v10 }
 0x1d0   :  { %611 = vpow2.f32 %v321_v11 }
 0x1d1   :  { %613 = vpow2.f32 %v327_v15 }
 0x1d2   :  { %615 = vpow2.f32 %v329_v17 }
 0x1d3   :  { %617 = vpow2.f32 %v335_v20 }
 0x1d4   :  { %v856_v19 = vpop.eup %607  ;;  %619 = vpow2.f32 %v331_v25 }
 0x1d5   :  { %v610_v21 = vpop.eup %609  ;;  %352 = vperm.xlu2 %588, %v856_v19   ;;  %621 = vpow2.f32 %v333_v26 }
 0x1d6   :  { %v612_v22 = vpop.eup %611  ;;  %349 = vperm.xlu1 %587, %v610_v21  }
 0x1d7   :  { %346 = vperm.xlu0 %586, %v612_v22   ;;  %v614_v27 = vpop.eup %613 }
 0x1d8   :  { %v616_v28 = vpop.eup %615 }
 0x1d9   :  { %v618_v29 = vpop.eup %617 }
 0x1da   :  { %v620_v30 = vpop.eup %619 }
 0x1db   :  { %v622_v31 = vpop.eup %621 }
 0x1dd   :  { %355 = vperm.xlu2 %588, %v614_v27  }
 0x1de   :  { %358 = vperm.xlu1 %587, %v616_v28  }
 0x1df   :  { %367 = vperm.xlu0 %586, %v618_v29  }
 0x1e5   :  { %361 = vperm.xlu2 %588, %v620_v30  }
 0x1e6   :  { %364 = vperm.xlu1 %587, %v622_v31  }
 0x22f   :  { %v353_v41 = vpop.permute.xlu2 %352 }
 0x230   :  { %v371_v49 = vperm.slane %v353_v41, %v838_v34 }
 0x237   :  { %v356_v44 = vpop.permute.xlu2 %355 }
 0x238   :  { %v372_v52 = vperm.slane %v356_v44, %v838_v34 }
 0x23f   :  { %v362_v53 = vpop.permute.xlu2 %361 }
 0x240   :  { %v374_v57 = vperm.slane %v362_v53, %v838_v34 }
 0x248   :  { %v350_v42 = vpop.permute.xlu1 %349 }
 0x249   :  { %v347_v43 = vpop.permute.xlu0 %346  ;;  %v370_v45 = vperm.slane %v350_v42, %v838_v34 }
 0x24a   :  { %v369_v46 = vperm.slane %v347_v43, %v838_v34 }
 0x24c   :  { %v377_v47 = vsel %vm277_vm0, %v370_v45, %v369_v46 }
 0x24d   :  { %v378_v50 = vsel %vm279_vm1, %v371_v49, %v377_v47 }
 0x24e   :  { %v379_v54 = vsel %vm281_vm2, %v372_v52, %v378_v50 }
 0x250   :  { %v359_v48 = vpop.permute.xlu1 %358 }
 0x251   :  { %v373_v51 = vperm.slane %v359_v48, %v838_v34  ;;  %v368_v56 = vpop.permute.xlu0 %367 }
 0x252   :  { %v376_v60 = vperm.slane %v368_v56, %v838_v34 }
 0x253   :  { %v380_v55 = vsel %vm283_vm3, %v373_v51, %v379_v54 }
 0x254   :  { %v381_v61 = vsel %vm285_vm4, %v374_v57, %v380_v55 }
 0x258   :  { %v365_v58 = vpop.permute.xlu1 %364 }
 0x259   :  { %v375_v59 = vperm.slane %v365_v58, %v838_v34 }
 0x25b   :  { %v382_v62 = vsel %vm287_vm5, %v375_v59, %v381_v61 }
 0x25c   :  { %v383_v63 = vsel %vm289_vm6, %v376_v60, %v382_v62 }
 0x25d   :  { %v385_v0 = vsel %vm292_vm7, %v383_v63, 0.0 }
 0x25e   :  { %386 = vadd.xlane.f32.xlu2 %v385_v0 }
 0x2d1   :  { %v387_v1 = vpop.xlane.xlu2 %386 }
 0x2d2   :  { %623 = vrcp.f32 %v387_v1 }
 0x2d8   :  { %v624_v2 = vpop.eup %623 }
 0x2d9   :  { %v391_v3 = vperm.slane %v624_v2, 1  ;;  %v390_v4 = vperm.slane %v624_v2, 0  ;;  %v393_v7 = vperm.slane %v624_v2, 3  ;;  %v392_v34 = vperm.slane %v624_v2, 2 }
 0x2da   :  { %v395_v10 = vperm.slane %v624_v2, 5  ;;  %v394_v11 = vperm.slane %v624_v2, 4  ;;  %v397_v14 = vperm.slane %v624_v2, 7  ;;  %v396_v15 = vperm.slane %v624_v2, 6 }
 0x2db   :  { %v407_v5 = vmul.f32 %v610_v21, %v391_v3  ;;  %v406_v6 = vmul.f32 %v612_v22, %v390_v4  ;;  %v409_v8 = vmul.f32 %v614_v27, %v393_v7  ;;  %v408_v9 = vmul.f32 %v856_v19, %v392_v34 }
 0x2dc   :  { %v411_v12 = vmul.f32 %v620_v30, %v395_v10  ;;  %v410_v13 = vmul.f32 %v616_v28, %v394_v11  ;;  %v413_v16 = vmul.f32 %v618_v29, %v397_v14  ;;  %v412_v17 = vmul.f32 %v622_v31, %v396_v15 }
 0x2dd   :  { %421 = vperm.xlu0 %586, %v407_v5   ;;  %416 = vperm.xlu1 %587, %v406_v6  }
 0x2e5   :  { %431 = vperm.xlu0 %586, %v409_v8   ;;  %426 = vperm.xlu1 %587, %v408_v9  }
 0x2ed   :  { %441 = vperm.xlu0 %586, %v411_v12   ;;  %436 = vperm.xlu1 %587, %v410_v13  }
 0x2f5   :  { %451 = vperm.xlu0 %586, %v413_v16   ;;  %446 = vperm.xlu1 %587, %v412_v17  }
 0x34f   :  { %v422_v18 = vpop.permute.xlu0 %421  ;;  %v417_v20 = vpop.permute.xlu1 %416 }
 0x350   :  { %v455_v21 = vmul.f32 %v422_v18, %v822_v38  ;;  %v454_v19 = vmul.f32 %v417_v20, %v813_v35 }
 0x352   :  { %v468_v22 = vrot.slane %v455_v21, 4  ;;  %v462_v23 = vrot.slane %v454_v19, 4 }
 0x354   :  { %v469_v28 = vadd.f32 %v468_v22, %v455_v21  ;;  %v463_v30 = vadd.f32 %v462_v23, %v454_v19 }
 0x356   :  { %v470_v42 = vrot.slane %v469_v28, 2  ;;  %v464_v43 = vrot.slane %v463_v30, 2 }
 0x357   :  { %v432_v24 = vpop.permute.xlu0 %431  ;;  %v427_v25 = vpop.permute.xlu1 %426 }
 0x358   :  { %v457_v26 = vmul.f32 %v432_v24, %v817_v36  ;;  %v456_v27 = vmul.f32 %v427_v25, %v808_v32  ;;  %v471_v48 = vadd.f32 %v470_v42, %v469_v28  ;;  %v465_v49 = vadd.f32 %v464_v43, %v463_v30 }
 0x35a   :  { %v480_v29 = vrot.slane %v457_v26, 4  ;;  %v474_v31 = vrot.slane %v456_v27, 4  ;;  %v472_v54 = vrot.slane %v471_v48, 1  ;;  %v466_v55 = vrot.slane %v465_v49, 1 }
 0x35c   :  { %v475_v41 = vadd.f32 %v474_v31, %v456_v27  ;;  %v481_v44 = vadd.f32 %v480_v29, %v457_v26  ;;  %v473_v63 = vadd.f32 %v472_v54, %v471_v48  ;;  %v467_v0 = vadd.f32 %v466_v55, %v465_v49 }
 0x35e   :  { %v476_v45 = vrot.slane %v475_v41, 2  ;;  %v482_v36 = vrot.slane %v481_v44, 2  ;;  %v518_v8 = vsel %vm277_vm0, %v473_v63, %v467_v0 }
 0x35f   :  { %v442_v38 = vpop.permute.xlu0 %441  ;;  %v437_v46 = vpop.permute.xlu1 %436 }
 0x360   :  { %v459_v35 = vmul.f32 %v442_v38, %v810_v33  ;;  %v458_v47 = vmul.f32 %v437_v46, %v826_v39  ;;  %v477_v50 = vadd.f32 %v476_v45, %v475_v41  ;;  %v483_v56 = vadd.f32 %v482_v36, %v481_v44 }
 0x362   :  { %v492_v32 = vrot.slane %v459_v35, 4  ;;  %v486_v51 = vrot.slane %v458_v47, 4  ;;  %v478_v57 = vrot.slane %v477_v50, 1  ;;  %v484_v1 = vrot.slane %v483_v56, 1 }
 0x364   :  { %v493_v52 = vadd.f32 %v492_v32, %v459_v35  ;;  %v487_v53 = vadd.f32 %v486_v51, %v458_v47  ;;  %v479_v3 = vadd.f32 %v478_v57, %v477_v50  ;;  %v485_v9 = vadd.f32 %v484_v1, %v483_v56 }
 0x366   :  { %v494_v58 = vrot.slane %v493_v52, 2  ;;  %v488_v59 = vrot.slane %v487_v53, 2  ;;  %v519_v11 = vsel %vm279_vm1, %v479_v3, %v518_v8 }
 0x367   :  { %v452_v60 = vpop.permute.xlu0 %451  ;;  %v447_v61 = vpop.permute.xlu1 %446  ;;  %v520_v16 = vsel %vm281_vm2, %v485_v9, %v519_v11 }
 0x368   :  { %v489_v62 = vadd.f32 %v488_v59, %v487_v53  ;;  %v461_v33 = vmul.f32 %v452_v60, %v828_v40  ;;  %v460_v39 = vmul.f32 %v447_v61, %v819_v37  ;;  %v495_v2 = vadd.f32 %v494_v58, %v493_v52 }
 0x36a   :  { %v490_v4 = vrot.slane %v489_v62, 1  ;;  %v504_v5 = vrot.slane %v461_v33, 4  ;;  %v498_v6 = vrot.slane %v460_v39, 4  ;;  %v496_v10 = vrot.slane %v495_v2, 1 }
 0x36c   :  { %v505_v7 = vadd.f32 %v504_v5, %v461_v33  ;;  %v499_v34 = vadd.f32 %v498_v6, %v460_v39  ;;  %v491_v12 = vadd.f32 %v490_v4, %v489_v62  ;;  %v497_v15 = vadd.f32 %v496_v10, %v495_v2 }
 0x36e   :  { %v506_v40 = vrot.slane %v505_v7, 2  ;;  %v500_v13 = vrot.slane %v499_v34, 2  ;;  %v521_v17 = vsel %vm283_vm3, %v491_v12, %v520_v16 }
 0x36f   :  { %v522_v22 = vsel %vm285_vm4, %v497_v15, %v521_v17 }
 0x370   :  { %v507_v37 = vadd.f32 %v506_v40, %v505_v7  ;;  %v501_v14 = vadd.f32 %v500_v13, %v499_v34 }
 0x372   :  { %v508_v18 = vrot.slane %v507_v37, 1  ;;  %v502_v20 = vrot.slane %v501_v14, 1 }
 0x374   :  { %v509_v21 = vadd.f32 %v508_v18, %v507_v37  ;;  %v503_v19 = vadd.f32 %v502_v20, %v501_v14 }
 0x376   :  { %v523_v23 = vsel %vm287_vm5, %v503_v19, %v522_v22 }
 0x377   :  { %v524_v24 = vsel %vm289_vm6, %v509_v21, %v523_v23 }
 0x378   :  { %526 = vst [vmem:[#allocation10] sm:$0xff] %v524_v24 }
 0x379   :  { %537 = dma.vmem_to_hbm [thread:$0]  %s533_s18, 128, %s535_s21, [#allocation4]  }
 0x37a   :  { %751 = dma.done.wait [#allocation4], 128  }
 0x37b   :  { %752 = vsyncadd [#allocation4], 4294967168 }
 0x37c   :  { %542 = vsyncpa [#allocation3], 1 }
 0x37d   :  { %543 = vsyncpa [#allocation6], 1 }
 0x37e   :  { %544 = vsyncpa [#allocation9], 1 }
 0x37f   :  { %545 = vsyncpa [#allocation4], 1 }

</bundles_post_ra>
